<compile_context>
chip_gen: v5e
topology: v5e:2x2
jax: 0.10.0
libtpu: 0.0.40
codegen_flags: <defaults>
</compile_context>

<pallas_src>
import jax
import jax.numpy as jnp
from jax.experimental import pallas as pl
from jax.experimental.pallas import tpu as pltpu


def _sign_kernel(x_ref, wbd_ref, c_ref, wfc_ref, bfc_ref, out_ref):
    """One N-tile of the SIGN forward pass (hops fused via block-diagonal weights).

    x_ref   : (TILE_N, K*F)   bf16  -- hop-concatenated feature tile (streams over N)
    wbd_ref : (K*F, K*H)      bf16  -- block-diag Linear weights, BN scale folded (resident)
    c_ref   : (1, K*H)        f32   -- Linear bias + BN shift, concatenated (resident)
    wfc_ref : (K*H, C_pad)    bf16  -- fc weight, class dim lane-padded to 128 (resident)
    bfc_ref : (1, C_pad)      f32   -- fc bias; padded class columns hold -1e30 (resident)
    out_ref : (TILE_N, C_pad) bf16  -- log_softmax output (lane-dense)
    """
    # Stage 1: all K per-hop Linear layers as a single 96-deep contraction (MXU).
    h = jnp.dot(x_ref[...], wbd_ref[...], preferred_element_type=jnp.float32)
    h = jnp.maximum(h + c_ref[...], 0.0)     # fused bias + eval-mode BN affine + ReLU (f32)
    # dropout: identity in eval mode.
    # Stage 2: fc over the concatenated hidden as one matmul (no per-hop accumulate).
    logits = jnp.dot(h.astype(wfc_ref.dtype), wfc_ref[...],
                     preferred_element_type=jnp.float32) + bfc_ref[...]
    # log_softmax in f32; pad columns sit at -1e30 -> exp underflows to exactly 0.
    m = jnp.max(logits, axis=-1, keepdims=True)
    shifted = logits - m
    lse = jnp.log(jnp.sum(jnp.exp(shifted), axis=-1, keepdims=True))
    out_ref[...] = (shifted - lse).astype(out_ref.dtype)


# ------------------------- one-time parameter / feature prep -------------------------

def fold_sign_params(W, b, scale, shift, Wfc, bfc, *, compute_dtype=jnp.bfloat16):
    """Fold eval-mode BN + Linear bias, build block-diag / concatenated fc weights."""
    K, F, H = W.shape
    C = Wfc.shape[-1]

    W_fused = W * scale                                   # (K, F, H)
    c_cat = (b * scale + shift).reshape(1, K * H)         # (1, K*H) f32

    # Block-diagonal (K*F, K*H): hop i's weights in block (i, i), zeros elsewhere.
    W_bd = jnp.zeros((K * F, K * H), jnp.float32)
    for i in range(K):
        W_bd = W_bd.at[i * F:(i + 1) * F, i * H:(i + 1) * H].set(W_fused[i])

    # fc weight concatenated over hops along the hidden axis, class dim padded to 128
    # lanes.  Pad columns: zero weight + -1e30 bias -> zero softmax mass.
    c_pad = max(128, ((C + 127) // 128) * 128)
    Wfc_p = jnp.zeros((K * H, c_pad), jnp.float32).at[:, :C].set(Wfc.reshape(K * H, C))
    bfc_p = jnp.full((1, c_pad), -1e30, jnp.float32).at[:, :C].set(bfc.reshape(-1))

    return (W_bd.astype(compute_dtype),
            c_cat.astype(jnp.float32),
            Wfc_p.astype(compute_dtype),
            bfc_p.astype(jnp.float32))


def prepare_sign_features(feature, *, compute_dtype=jnp.bfloat16):
    """(K, N, F) -> (N, K*F) bf16.  One-time producer-side pass (transpose+cast fuse);
    ideally the hop-aggregation pipeline emits this layout directly."""
    K, N, F = feature.shape
    return jnp.transpose(feature, (1, 0, 2)).reshape(N, K * F).astype(compute_dtype)


# ------------------------------------ forward ------------------------------------

def sign_forward_prepared(feat_cat, W_bd, c_cat, Wfc_p, bfc_p, *, n_class,
                          tile_n=1024, out_dtype=jnp.bfloat16):
    """SIGN forward on pre-packed inputs (see prepare_sign_features / fold_sign_params)."""
    N, KF = feat_cat.shape
    KH = W_bd.shape[-1]
    c_pad = Wfc_p.shape[-1]

    # tile_n: multiple of 16 (bf16 sublane packing); no need to exceed N (rounded up).
    tile_n = max(16, min(int(tile_n), ((N + 15) // 16) * 16))
    tile_n = ((tile_n + 15) // 16) * 16

    grid = (pl.cdiv(N, tile_n),)   # ragged last tile handled by Pallas (rows independent)

    grid_spec = pltpu.PrefetchScalarGridSpec(
        num_scalar_prefetch=0,
        grid=grid,
        in_specs=[
            pl.BlockSpec((tile_n, KF),  lambda i: (i, 0)),   # feature tile (streamed)
            pl.BlockSpec((KF, KH),      lambda i: (0, 0)),   # resident block-diag weights
            pl.BlockSpec((1, KH),       lambda i: (0, 0)),   # resident fused bias
            pl.BlockSpec((KH, c_pad),   lambda i: (0, 0)),   # resident fc weights
            pl.BlockSpec((1, c_pad),    lambda i: (0, 0)),   # resident fc bias
        ],
        out_specs=pl.BlockSpec((tile_n, c_pad), lambda i: (i, 0)),
    )

    out_padded = pl.pallas_call(
        _sign_kernel,
        out_shape=jax.ShapeDtypeStruct((N, c_pad), out_dtype),
        grid_spec=grid_spec,
        compiler_params=pltpu.CompilerParams(
            dimension_semantics=("parallel",),   # N tiles shard across TensorCores
        ),
    )(feat_cat, W_bd, c_cat, Wfc_p, bfc_p)

    return out_padded[:, :n_class]


def sign_forward(feature, W, b, scale, shift, Wfc, bfc, *, tile_n=1024,
                 compute_dtype=jnp.bfloat16, out_dtype=jnp.bfloat16):
    """Convenience wrapper: prep (one-time) + kernel call."""
    n_class = Wfc.shape[-1]
    packed = fold_sign_params(W, b, scale, shift, Wfc, bfc, compute_dtype=compute_dtype)
    feat_cat = prepare_sign_features(feature, compute_dtype=compute_dtype)
    return sign_forward_prepared(feat_cat, *packed, n_class=n_class,
                                 tile_n=tile_n, out_dtype=out_dtype)


# ------------------------------------ reference ------------------------------------

def sign_reference(feature, W, b, scale, shift, Wfc, bfc, compute_dtype=jnp.bfloat16):
    """Pure-JAX reference (module semantics, eval mode, same bf16 matmul operands)."""
    K = feature.shape[0]
    W_fused = W * scale
    c_fused = b * scale + shift
    xs = []
    for i in range(K):
        h = jnp.dot(feature[i].astype(compute_dtype),
                    W_fused[i].astype(compute_dtype),
                    preferred_element_type=jnp.float32) + c_fused[i]
        xs.append(jnp.maximum(h, 0.0))
    cat = jnp.concatenate(xs, axis=1).astype(compute_dtype)
    Wfc_full = jnp.concatenate([Wfc[i] for i in range(K)], axis=0).astype(compute_dtype)
    logits = jnp.dot(cat, Wfc_full, preferred_element_type=jnp.float32) + bfc.reshape(-1)
    return jax.nn.log_softmax(logits, axis=1)


if __name__ == "__main__":
    # Small shapes consistent with SIGN's __init__.
    n_feature, n_hidden, n_class, k = 32, 32, 8, 2
    K = k + 1
    N = 1000            # not a tile multiple -> exercises the ragged last N tile

    key = jax.random.PRNGKey(0)
    keys = jax.random.split(key, 10)

    # Input: stacked k-hop aggregated features.
    feature = jax.random.normal(keys[0], (K, N, n_feature), dtype=jnp.float32)

    # Per-hop Linear layers (weights stored as (in, out)).
    W = jax.random.normal(keys[1], (K, n_feature, n_hidden), dtype=jnp.float32) * 0.1
    b = jax.random.normal(keys[2], (K, 1, n_hidden), dtype=jnp.float32) * 0.1

    # Per-hop BatchNorm1d (eval mode): fold gamma/beta/running stats into an affine.
    gamma = 1.0 + 0.1 * jax.random.normal(keys[3], (K, 1, n_hidden), dtype=jnp.float32)
    beta = 0.1 * jax.random.normal(keys[4], (K, 1, n_hidden), dtype=jnp.float32)
    r_mean = 0.1 * jax.random.normal(keys[5], (K, 1, n_hidden), dtype=jnp.float32)
    r_var = jnp.abs(1.0 + 0.1 * jax.random.normal(keys[6], (K, 1, n_hidden),
                                                  dtype=jnp.float32))
    eps = 1e-5
    scale = gamma / jnp.sqrt(r_var + eps)
    shift = beta - r_mean * scale

    # Final fc: ((k+1)*n_hidden -> n_class), stored split per hop as (K, H, C).
    Wfc = jax.random.normal(keys[7], (K, n_hidden, n_class), dtype=jnp.float32) * 0.1
    bfc = jax.random.normal(keys[8], (1, n_class), dtype=jnp.float32) * 0.1

    # tile_n=256 at this demo size -> 4 grid steps (>=2 per TensorCore on v7x).
    out = sign_forward(feature, W, b, scale, shift, Wfc, bfc, tile_n=256)
    out = jax.block_until_ready(out)

    ref = sign_reference(feature, W, b, scale, shift, Wfc, bfc)
    out_f32 = out.astype(jnp.float32)

    assert out.shape == (N, n_class)
    # bf16 output store -> ~3 significant digits on the log-probs.
    assert jnp.allclose(out_f32, ref, atol=5e-2, rtol=5e-2), "mismatch vs reference"
    # Sanity: rows are valid log-probabilities (sum of exp == 1).
    assert jnp.allclose(jnp.sum(jnp.exp(out_f32), axis=1), 1.0, atol=3e-2)

    print("KERNEL_OK")
</pallas_src>

<mosaic_0001>
module attributes {stable_mosaic.version = 11 : i64} {
  func.func @_sign_kernel(%arg0: i32, %arg1: memref<256x96xbf16, #tpu.memory_space<vmem>>, %arg2: memref<96x96xbf16, #tpu.memory_space<vmem>>, %arg3: memref<1x96xf32, #tpu.memory_space<vmem>>, %arg4: memref<96x128xbf16, #tpu.memory_space<vmem>>, %arg5: memref<1x128xf32, #tpu.memory_space<vmem>>, %arg6: memref<256x128xbf16, #tpu.memory_space<vmem>>) attributes {dimension_semantics = [#tpu.dimension_semantics<parallel>], iteration_bounds = array<i64: 4>, scalar_prefetch = 0 : i64, scratch_operands = 0 : i64, tpu.core_type = #tpu.core_type<tc>, window_params = [{transform_indices = @transform_0, window_bounds = array<i64: 256, 96>}, {pipeline_mode = #tpu.pipeline_mode<synchronous>, transform_indices = @transform_1, window_bounds = array<i64: 96, 96>}, {pipeline_mode = #tpu.pipeline_mode<synchronous>, transform_indices = @transform_2, window_bounds = array<i64: 1, 96>}, {pipeline_mode = #tpu.pipeline_mode<synchronous>, transform_indices = @transform_3, window_bounds = array<i64: 96, 128>}, {pipeline_mode = #tpu.pipeline_mode<synchronous>, transform_indices = @transform_4, window_bounds = array<i64: 1, 128>}, {transform_indices = @transform_5, window_bounds = array<i64: 256, 128>}]} {
    %c0 = arith.constant 0 : index
    %c0_0 = arith.constant 0 : index
    %0 = vector.load %arg1[%c0, %c0_0] : memref<256x96xbf16, #tpu.memory_space<vmem>>, vector<256x96xbf16>
    %c0_1 = arith.constant 0 : index
    %c0_2 = arith.constant 0 : index
    %1 = vector.load %arg2[%c0_1, %c0_2] : memref<96x96xbf16, #tpu.memory_space<vmem>>, vector<96x96xbf16>
    %cst = arith.constant dense<0.000000e+00> : vector<256x96xf32>
    %2 = tpu.matmul %0, %1, %cst {dimension_numbers = #tpu.dot_dimension_numbers<[1], [0], [0], [1], [0, 0, 1, 1], [], []>} : vector<256x96xbf16>, vector<96x96xbf16>, vector<256x96xf32> -> vector<256x96xf32>
    %c0_3 = arith.constant 0 : index
    %c0_4 = arith.constant 0 : index
    %3 = vector.load %arg3[%c0_3, %c0_4] : memref<1x96xf32, #tpu.memory_space<vmem>>, vector<1x96xf32>
    %4 = vector.broadcast %3 : vector<1x96xf32> to vector<256x96xf32>
    %5 = arith.addf %2, %4 : vector<256x96xf32>
    %cst_5 = arith.constant 0.000000e+00 : f32
    %6 = vector.broadcast %cst_5 : f32 to vector<256x96xf32>
    %7 = arith.maximumf %5, %6 : vector<256x96xf32>
    %8 = arith.truncf %7 : vector<256x96xf32> to vector<256x96xbf16>
    %c0_6 = arith.constant 0 : index
    %c0_7 = arith.constant 0 : index
    %9 = vector.load %arg4[%c0_6, %c0_7] : memref<96x128xbf16, #tpu.memory_space<vmem>>, vector<96x128xbf16>
    %cst_8 = arith.constant dense<0.000000e+00> : vector<256x128xf32>
    %10 = tpu.matmul %8, %9, %cst_8 {dimension_numbers = #tpu.dot_dimension_numbers<[1], [0], [0], [1], [0, 0, 1, 1], [], []>} : vector<256x96xbf16>, vector<96x128xbf16>, vector<256x128xf32> -> vector<256x128xf32>
    %c0_9 = arith.constant 0 : index
    %c0_10 = arith.constant 0 : index
    %11 = vector.load %arg5[%c0_9, %c0_10] : memref<1x128xf32, #tpu.memory_space<vmem>>, vector<1x128xf32>
    %12 = vector.broadcast %11 : vector<1x128xf32> to vector<256x128xf32>
    %13 = arith.addf %10, %12 : vector<256x128xf32>
    %cst_11 = arith.constant dense<0xFF800000> : vector<256xf32>
    %14 = vector.multi_reduction <maximumf>, %13, %cst_11 [1] : vector<256x128xf32> to vector<256xf32>
    %15 = vector.shape_cast %14 : vector<256xf32> to vector<256x1xf32>
    %16 = vector.broadcast %15 : vector<256x1xf32> to vector<256x128xf32>
    %17 = arith.subf %13, %16 : vector<256x128xf32>
    %18 = math.exp %17 : vector<256x128xf32>
    %cst_12 = arith.constant dense<0.000000e+00> : vector<256xf32>
    %19 = vector.multi_reduction <add>, %18, %cst_12 [1] : vector<256x128xf32> to vector<256xf32>
    %20 = vector.shape_cast %19 : vector<256xf32> to vector<256x1xf32>
    %21 = math.log %20 : vector<256x1xf32>
    %22 = vector.broadcast %21 : vector<256x1xf32> to vector<256x128xf32>
    %23 = arith.subf %17, %22 : vector<256x128xf32>
    %24 = arith.truncf %23 : vector<256x128xf32> to vector<256x128xbf16>
    %c0_13 = arith.constant 0 : index
    %c0_14 = arith.constant 0 : index
    %25 = vector.load %arg6[%c0_13, %c0_14] : memref<256x128xbf16, #tpu.memory_space<vmem>>, vector<256x128xbf16>
    tpu.vector_store %arg6[%c0_13, %c0_14], %24 {strides = array<i32>} : memref<256x128xbf16, #tpu.memory_space<vmem>>, vector<256x128xbf16>,
    return
  }
  func.func @transform_0(%arg0: i32) -> (i32, i32) {
    %c0_i32 = arith.constant 0 : i32
    %c0_i32_0 = arith.constant 0 : i32
    return %arg0, %c0_i32 : i32, i32
  }
  func.func @transform_1(%arg0: i32) -> (i32, i32) {
    %c0_i32 = arith.constant 0 : i32
    %c0_i32_0 = arith.constant 0 : i32
    %c0_i32_1 = arith.constant 0 : i32
    return %c0_i32, %c0_i32_0 : i32, i32
  }
  func.func @transform_2(%arg0: i32) -> (i32, i32) {
    %c0_i32 = arith.constant 0 : i32
    %c0_i32_0 = arith.constant 0 : i32
    %c0_i32_1 = arith.constant 0 : i32
    return %c0_i32, %c0_i32_0 : i32, i32
  }
  func.func @transform_3(%arg0: i32) -> (i32, i32) {
    %c0_i32 = arith.constant 0 : i32
    %c0_i32_0 = arith.constant 0 : i32
    %c0_i32_1 = arith.constant 0 : i32
    return %c0_i32, %c0_i32_0 : i32, i32
  }
  func.func @transform_4(%arg0: i32) -> (i32, i32) {
    %c0_i32 = arith.constant 0 : i32
    %c0_i32_0 = arith.constant 0 : i32
    %c0_i32_1 = arith.constant 0 : i32
    return %c0_i32, %c0_i32_0 : i32, i32
  }
  func.func @transform_5(%arg0: i32) -> (i32, i32) {
    %c0_i32 = arith.constant 0 : i32
    %c0_i32_0 = arith.constant 0 : i32
    return %arg0, %c0_i32 : i32, i32
  }
}

</mosaic_0001>

<bundles_post_ra>
// kernel: tpu_custom_call.1
= control target key start
LH: loop header
LB: loop body
LE: loop exit
PB: predicated region body
PF: predicated region fallthrough
CT: control target
= control target key end

     0   :  { %10 = vsyncpa [#allocation3], 0  ;;  %s2389_s0 = inlined_call_operand.vmem [shape: bf16[1000,96], index: 0, kind: input, shape index: {}]   ;;  %s2390_s1 = inlined_call_operand.vmem [shape: bf16[96,96], index: 1, kind: input, shape index: {}]   ;;  %s2391_s2 = inlined_call_operand.vmem [shape: f32[1,96], index: 2, kind: input, shape index: {}]   ;;  %s2392_s3 = inlined_call_operand.vmem [shape: bf16[96,128], index: 3, kind: input, shape index: {}]   ;;  %s2393_s4 = inlined_call_operand.vmem [shape: f32[1,128], index: 4, kind: input, shape index: {}]   ;;  %s2394_s5 = inlined_call_operand.hbm [shape: bf16[1000,128], index: 5, kind: output, shape index: {}]  }
   0x1   :  { %12 = vsyncpa [#allocation3 + $0x1], 0  ;;  %s1833_s18 = smov 0   ;;  %s1835_s19 = smov 0  }
   0x2   :  { %s1837_s20 = smov 0   ;;  %s1839_s21 = smov 0  }
   0x3 LB: > { %s1854_s22 = sadd.s32 4294967295, %s1798_s21   ;;  %s1259_s23 = sadd.s32 4294967294, %s1798_s21   ;;  %s1798_s21 = sphi %s1839_s21, %s2401_s21   ;;  %s1794_s20 = sphi %s1837_s20, %s2400_s20   ;;  %s1790_s19 = sphi %s1835_s19, %s2399_s19   ;;  %s1786_s18 = sphi %s1833_s18, %s2398_s18  }
   0x4   : > { %s1858_s24 = sadd.s32 1, %s1798_s21   ;;  %s135_s25 = sadd.s32 1, %s1794_s20 }
   0x5   : > { %s132_s26 = ssub.s32 %s1798_s21, %s1858_s24  ;;  %p145_p0 = scmp.ne.s32.totalorder %s1794_s20, %s1790_s19 }
   0x6   : > { %p133_p1 = scmp.eq.s32.totalorder %s132_s26, 0  ;;  %p146_p2 = scmp.eq.s32.totalorder %s1854_s22, 3 }
   0x7   : > { %p151_p3 = scmp.ne.s32.totalorder %s1790_s19, %s1786_s18  ;;  %p152_p4 = scmp.eq.s32.totalorder %s1259_s23, 3 }
   0x8   : > { %s1869_s27 = scalar_select %p133_p1, %s1794_s20, %s135_s25  }
   0x9   : > { %p1871_p5 = por %p146_p2, %p145_p0  ;;  %p1875_p6 = por %p152_p4, %p151_p3 }
   0xa   : > { %p1262_p7 = scmp.ge.s32.totalorder %s1798_s21, 1  ;;  %p199_p8 = scmp.lt.s32.totalorder %s1798_s21, 5 }
   0xc   : > { %p200_p9 = pnand %p1262_p7, %p199_p8 }
   0xd   : > { %s1888_s9 = sshll.u32 (!%p200_p9), %s1854_s22, 5  ;;  %s228_s8 = sand.u32 (!%p200_p9), 1, %s1790_s19  }
   0xe   : > { %203 = sbr.rel (%p200_p9) target bundleno = 731 (0x2db), region = 40  ;;  %p236_p10 = scmp.lt.s32.totalorder (!%p200_p9), %s1888_s9, 124 }
   0xf   : > { %s1263_s10 = sshll.u32 (!%p200_p9), %s228_s8, 7  ;;  %s2328_s12 = scalar_lea.sflag (!%p200_p9), [#allocation3], %s228_s8 }
  0x10   : > { %s2278_s11 = scalar_lea.vmem (!%p200_p9), [#allocation2], %s1263_s10 }
  0x13   : > { %v1440_v0 = vld [vmem:[%s2390_s1 + $0x28] sm:$0xff]  ;;  %v1439_v1 = vld [vmem:[%s2390_s1 + $0x20] sm:$0xff]  ;;  %v1438_v2 = vld [vmem:[%s2390_s1 + $0x18] sm:$0xff]  ;;  %s237_s14 = scalar_select %p236_p10, %s1888_s9, 124  ;;  %vm415_vm0 = vcmask 785408  }
  0x14   : > { %466 = vmatpush.bf16.msra.mxu0 %v1440_v0  ;;  %1543 = vmatpush.bf16.msra.mxu2 %v1440_v0  ;;  %v1437_v3 = vld [vmem:[%s2390_s1 + $0x10] sm:$0xff]  ;;  %v1436_v4 = vld [vmem:[%s2390_s1 + $0x8] sm:$0xff]  ;;  %v1435_v5 = vld [vmem:[%s2390_s1] sm:$0xff]  ;;  %s1183_s13 = ssub.s32 (%p1871_p5), 125, %s1888_s9 }
  0x15   : > { %s1265_s17 = sshll.u32 %s237_s14, 2  ;;  %v1446_v18 = vld [vmem:[%s2392_s3 + $0x28] sm:$0xff]  ;;  %v1445_v19 = vld [vmem:[%s2392_s3 + $0x20] sm:$0xff]  ;;  %v1444_v20 = vld [vmem:[%s2392_s3 + $0x18] sm:$0xff]  ;;  %p1184_p11 = scmp.lt.s32.totalorder (%p1871_p5), %s1183_s13, 32 }
  0x16   : > { %s1907_s6 = scalar_lea.vmem %s2389_s0, %s1265_s17  ;;  %703 = vmatpush.bf16.msra.mxu1 %v1446_v18  ;;  %1549 = vmatpush.bf16.msra.mxu3 %v1446_v18  ;;  %v1443_v23 = vld [vmem:[%s2392_s3 + $0x10] sm:$0xff]  ;;  %v1442_v24 = vld [vmem:[%s2392_s3 + $0x8] sm:$0xff]  ;;  %v1441_v25 = vld [vmem:[%s2392_s3] sm:$0xff] }
  0x17   : > { %v1419_v6 = vld [vmem:[%s1907_s6] sm:$0xff]  ;;  %v1420_v8 = vld [vmem:[%s1907_s6 + $0x8] sm:$0xff]  ;;  %v1421_v10 = vld [vmem:[%s1907_s6 + $0x10] sm:$0xff] }
  0x18   : > { %467 = vmatpush.bf16.msra.mxu0 %v1439_v1  ;;  %1544 = vmatpush.bf16.msra.mxu2 %v1439_v1  ;;  %v1427_v7 = vld [vmem:[%s1907_s6 + $0x40] sm:$0xff]  ;;  %v1428_v9 = vld [vmem:[%s1907_s6 + $0x48] sm:$0xff]  ;;  %v1429_v11 = vld [vmem:[%s1907_s6 + $0x50] sm:$0xff] }
  0x19   : > { %v1422_v12 = vld [vmem:[%s1907_s6 + $0x18] sm:$0xff]  ;;  %v1423_v14 = vld [vmem:[%s1907_s6 + $0x20] sm:$0xff]  ;;  %v1424_v16 = vld [vmem:[%s1907_s6 + $0x28] sm:$0xff] }
  0x1a   : > { %v1430_v13 = vld [vmem:[%s1907_s6 + $0x58] sm:$0xff]  ;;  %v1431_v15 = vld [vmem:[%s1907_s6 + $0x60] sm:$0xff]  ;;  %v1432_v17 = vld [vmem:[%s1907_s6 + $0x68] sm:$0xff]  ;;  %704 = vmatpush.bf16.msra.mxu1 %v1445_v19  ;;  %1550 = vmatpush.bf16.msra.mxu3 %v1445_v19 }
  0x1b   : > { %v1425_v21 = vld [vmem:[%s1907_s6 + $0x30] sm:$0xff]  ;;  %v1426_v26 = vld [vmem:[%s1907_s6 + $0x38] sm:$0xff]  ;;  %v1962_v29 = vld [vmem:[%s2391_s2] ss:$0 sm:$0xff] }
  0x1c   : > { %468 = vmatpush.bf16.msra.mxu0 %v1438_v2  ;;  %1545 = vmatpush.bf16.msra.mxu2 %v1438_v2  ;;  %v1433_v22 = vld [vmem:[%s1907_s6 + $0x70] sm:$0xff]  ;;  %v1434_v27 = vld [vmem:[%s1907_s6 + $0x78] sm:$0xff] }
  0x1e   : > { %705 = vmatpush.bf16.msra.mxu1 %v1444_v20  ;;  %1551 = vmatpush.bf16.msra.mxu3 %v1444_v20 }
  0x20   : > { %469 = vmatpush.bf16.msra.mxu0 %v1437_v3  ;;  %1546 = vmatpush.bf16.msra.mxu2 %v1437_v3 }
  0x22   : > { %706 = vmatpush.bf16.msra.mxu1 %v1443_v23  ;;  %1552 = vmatpush.bf16.msra.mxu3 %v1443_v23 }
  0x24   : > { %470 = vmatpush.bf16.msra.mxu0 %v1436_v4  ;;  %1547 = vmatpush.bf16.msra.mxu2 %v1436_v4 }
  0x26   : > { %707 = vmatpush.bf16.msra.mxu1 %v1442_v24  ;;  %1553 = vmatpush.bf16.msra.mxu3 %v1442_v24 }
  0x28   : > { %471 = vmatpush.bf16.msra.mxu0 %v1435_v5  ;;  %1548 = vmatpush.bf16.msra.mxu2 %v1435_v5 }
  0x2a   : > { %708 = vmatpush.bf16.msra.mxu1 %v1441_v25  ;;  %1554 = vmatpush.bf16.msra.mxu3 %v1441_v25 }
  0x2b   : > { %1354 = vmatmul.msk.bf16.vlgmr.msra.gmra.mxu0 %vm415_vm0, %v1419_v6  ;;  %1362 = vmatmul.msk.bf16.vlgmr.msra.gmra.mxu2 %vm415_vm0, %v1427_v7 }
  0x3b   : > { %1355 = vmatmul.msk.bf16.gmra.mxu0 %vm415_vm0, %v1420_v8  ;;  %1363 = vmatmul.msk.bf16.gmra.mxu2 %vm415_vm0, %v1428_v9 }
  0x4b   : > { %1356 = vmatmul.msk.bf16.gmra.mxu0 %vm415_vm0, %v1421_v10  ;;  %1364 = vmatmul.msk.bf16.gmra.mxu2 %vm415_vm0, %v1429_v11 }
  0x5b   : > { %1357 = vmatmul.msk.bf16.gmra.mxu0 %vm415_vm0, %v1422_v12  ;;  %1365 = vmatmul.msk.bf16.gmra.mxu2 %vm415_vm0, %v1430_v13 }
  0x6b   : > { %1358 = vmatmul.msk.bf16.gmra.mxu0 %vm415_vm0, %v1423_v14  ;;  %1366 = vmatmul.msk.bf16.gmra.mxu2 %vm415_vm0, %v1431_v15 }
  0x7b   : > { %1359 = vmatmul.msk.bf16.gmra.mxu0 %vm415_vm0, %v1424_v16  ;;  %1367 = vmatmul.msk.bf16.gmra.mxu2 %vm415_vm0, %v1432_v17 }
  0x8b   : > { %1360 = vmatmul.msk.bf16.gmra.mxu0 %vm415_vm0, %v1425_v21  ;;  %1368 = vmatmul.msk.bf16.gmra.mxu2 %vm415_vm0, %v1433_v22 }
  0x9b   : > { %1361 = vmatmul.msk.bf16.gmra.mxu0 %vm415_vm0, %v1426_v26  ;;  %1369 = vmatmul.msk.bf16.gmra.mxu2 %vm415_vm0, %v1434_v27 }
  0xa8   : > { %v473_v28 = vpop.f32.mrf.mxu0 }
  0xa9   : > { %v474_v31 = vadd.f32 %v1962_v29, %v473_v28 }
  0xab   : > { %v553_v34 = vmax.f32 %v474_v31, 0.0 }
  0xae   : > { %v513_v30 = vpop.f32.mrf.mxu2 }
  0xaf   : > { %v514_v36 = vadd.f32 %v1962_v29, %v513_v30 }
  0xb0   : > { %v475_v32 = vpop.f32.mrf.mxu0 }
  0xb1   : > { %v476_v33 = vadd.f32 %v1962_v29, %v475_v32  ;;  %v569_v41 = vmax.f32 %v514_v36, 0.0 }
  0xb3   : > { %v554_v35 = vmax.f32 %v476_v33, 0.0 }
  0xb5   : > { %v585_v37 = vpack.c.bf16 %v554_v35, %v553_v34 }
  0xb6   : > { %v515_v38 = vpop.f32.mrf.mxu2 }
  0xb7   : > { %v516_v39 = vadd.f32 %v1962_v29, %v515_v38  ;;  %1394 = vmatmul.msk.bf16.vlgmr.msra.gmra.mxu1 %vm415_vm0, %v585_v37 }
  0xb8   : > { %v478_v40 = vpop.f32.mrf.mxu0 }
  0xb9   : > { %v570_v42 = vmax.f32 %v516_v39, 0.0  ;;  %v479_v45 = vadd.f32 %v1962_v29, %v478_v40 }
  0xbb   : > { %v593_v43 = vpack.c.bf16 %v570_v42, %v569_v41  ;;  %v555_v48 = vmax.f32 %v479_v45, 0.0 }
  0xbd   : > { %1402 = vmatmul.msk.bf16.vlgmr.msra.gmra.mxu3 %vm415_vm0, %v593_v43 }
  0xbe   : > { %v518_v44 = vpop.f32.mrf.mxu2 }
  0xbf   : > { %v519_v50 = vadd.f32 %v1962_v29, %v518_v44 }
  0xc0   : > { %v480_v46 = vpop.f32.mrf.mxu0 }
  0xc1   : > { %v481_v47 = vadd.f32 %v1962_v29, %v480_v46  ;;  %v571_v55 = vmax.f32 %v519_v50, 0.0 }
  0xc3   : > { %v556_v49 = vmax.f32 %v481_v47, 0.0 }
  0xc5   : > { %v586_v51 = vpack.c.bf16 %v556_v49, %v555_v48 }
  0xc6   : > { %v520_v52 = vpop.f32.mrf.mxu2 }
  0xc7   : > { %v521_v53 = vadd.f32 %v1962_v29, %v520_v52  ;;  %1395 = vmatmul.msk.bf16.gmra.mxu1 %vm415_vm0, %v586_v51 }
  0xc8   : > { %v483_v54 = vpop.f32.mrf.mxu0 }
  0xc9   : > { %v572_v56 = vmax.f32 %v521_v53, 0.0  ;;  %v484_v59 = vadd.f32 %v1962_v29, %v483_v54 }
  0xcb   : > { %v594_v57 = vpack.c.bf16 %v572_v56, %v571_v55  ;;  %v557_v62 = vmax.f32 %v484_v59, 0.0 }
  0xcd   : > { %1403 = vmatmul.msk.bf16.gmra.mxu3 %vm415_vm0, %v594_v57 }
  0xce   : > { %v523_v58 = vpop.f32.mrf.mxu2 }
  0xcf   : > { %v524_v0 = vadd.f32 %v1962_v29, %v523_v58 }
  0xd0   : > { %v485_v60 = vpop.f32.mrf.mxu0 }
  0xd1   : > { %v486_v61 = vadd.f32 %v1962_v29, %v485_v60  ;;  %v573_v5 = vmax.f32 %v524_v0, 0.0 }
  0xd3   : > { %v558_v63 = vmax.f32 %v486_v61, 0.0 }
  0xd5   : > { %v587_v1 = vpack.c.bf16 %v558_v63, %v557_v62 }
  0xd6   : > { %v525_v2 = vpop.f32.mrf.mxu2 }
  0xd7   : > { %v526_v3 = vadd.f32 %v1962_v29, %v525_v2  ;;  %1396 = vmatmul.msk.bf16.gmra.mxu1 %vm415_vm0, %v587_v1 }
  0xd8   : > { %v488_v4 = vpop.f32.mrf.mxu0 }
  0xd9   : > { %v574_v6 = vmax.f32 %v526_v3, 0.0  ;;  %v489_v9 = vadd.f32 %v1962_v29, %v488_v4 }
  0xdb   : > { %v595_v7 = vpack.c.bf16 %v574_v6, %v573_v5  ;;  %v559_v12 = vmax.f32 %v489_v9, 0.0 }
  0xdd   : > { %1404 = vmatmul.msk.bf16.gmra.mxu3 %vm415_vm0, %v595_v7 }
  0xde   : > { %v528_v8 = vpop.f32.mrf.mxu2 }
  0xdf   : > { %v529_v14 = vadd.f32 %v1962_v29, %v528_v8 }
  0xe0   : > { %v490_v10 = vpop.f32.mrf.mxu0 }
  0xe1   : > { %v491_v11 = vadd.f32 %v1962_v29, %v490_v10  ;;  %v575_v19 = vmax.f32 %v529_v14, 0.0  ;;  %v2015_v14 = vld [vmem:[%s2393_s4] ss:$0 sm:$0xff] }
  0xe3   : > { %v560_v13 = vmax.f32 %v491_v11, 0.0 }
  0xe5   : > { %v588_v15 = vpack.c.bf16 %v560_v13, %v559_v12 }
  0xe6   : > { %v530_v16 = vpop.f32.mrf.mxu2 }
  0xe7   : > { %v531_v17 = vadd.f32 %v1962_v29, %v530_v16  ;;  %1397 = vmatmul.msk.bf16.gmra.mxu1 %vm415_vm0, %v588_v15 }
  0xe8   : > { %v493_v18 = vpop.f32.mrf.mxu0 }
  0xe9   : > { %v576_v20 = vmax.f32 %v531_v17, 0.0  ;;  %v494_v23 = vadd.f32 %v1962_v29, %v493_v18 }
  0xeb   : > { %v596_v21 = vpack.c.bf16 %v576_v20, %v575_v19  ;;  %v561_v26 = vmax.f32 %v494_v23, 0.0 }
  0xed   : > { %1405 = vmatmul.msk.bf16.gmra.mxu3 %vm415_vm0, %v596_v21 }
  0xee   : > { %v533_v22 = vpop.f32.mrf.mxu2 }
  0xef   : > { %v534_v28 = vadd.f32 %v1962_v29, %v533_v22 }
  0xf0   : > { %v495_v24 = vpop.f32.mrf.mxu0 }
  0xf1   : > { %v496_v25 = vadd.f32 %v1962_v29, %v495_v24  ;;  %v577_v34 = vmax.f32 %v534_v28, 0.0 }
  0xf3   : > { %v562_v27 = vmax.f32 %v496_v25, 0.0 }
  0xf5   : > { %v589_v30 = vpack.c.bf16 %v562_v27, %v561_v26 }
  0xf6   : > { %v535_v31 = vpop.f32.mrf.mxu2 }
  0xf7   : > { %v536_v32 = vadd.f32 %v1962_v29, %v535_v31  ;;  %1398 = vmatmul.msk.bf16.gmra.mxu1 %vm415_vm0, %v589_v30 }
  0xf8   : > { %v498_v33 = vpop.f32.mrf.mxu0 }
  0xf9   : > { %v578_v35 = vmax.f32 %v536_v32, 0.0  ;;  %v499_v38 = vadd.f32 %v1962_v29, %v498_v33 }
  0xfb   : > { %v597_v36 = vpack.c.bf16 %v578_v35, %v577_v34  ;;  %v563_v41 = vmax.f32 %v499_v38, 0.0 }
  0xfd   : > { %1406 = vmatmul.msk.bf16.gmra.mxu3 %vm415_vm0, %v597_v36 }
  0xfe   : > { %v538_v37 = vpop.f32.mrf.mxu2 }
  0xff   : > { %v539_v43 = vadd.f32 %v1962_v29, %v538_v37 }
 0x100   : > { %v500_v39 = vpop.f32.mrf.mxu0 }
 0x101   : > { %v501_v40 = vadd.f32 %v1962_v29, %v500_v39  ;;  %v579_v48 = vmax.f32 %v539_v43, 0.0 }
 0x103   : > { %v564_v42 = vmax.f32 %v501_v40, 0.0 }
 0x105   : > { %v590_v44 = vpack.c.bf16 %v564_v42, %v563_v41 }
 0x106   : > { %v540_v45 = vpop.f32.mrf.mxu2 }
 0x107   : > { %v541_v46 = vadd.f32 %v1962_v29, %v540_v45  ;;  %1399 = vmatmul.msk.bf16.gmra.mxu1 %vm415_vm0, %v590_v44 }
 0x108   : > { %v503_v47 = vpop.f32.mrf.mxu0 }
 0x109   : > { %v580_v49 = vmax.f32 %v541_v46, 0.0  ;;  %v504_v52 = vadd.f32 %v1962_v29, %v503_v47 }
 0x10b   : > { %v598_v50 = vpack.c.bf16 %v580_v49, %v579_v48  ;;  %v565_v55 = vmax.f32 %v504_v52, 0.0 }
 0x10d   : > { %1407 = vmatmul.msk.bf16.gmra.mxu3 %vm415_vm0, %v598_v50 }
 0x10e   : > { %v543_v51 = vpop.f32.mrf.mxu2 }
 0x10f   : > { %v544_v57 = vadd.f32 %v1962_v29, %v543_v51 }
 0x110   : > { %v505_v53 = vpop.f32.mrf.mxu0 }
 0x111   : > { %v506_v54 = vadd.f32 %v1962_v29, %v505_v53  ;;  %v581_v62 = vmax.f32 %v544_v57, 0.0 }
 0x113   : > { %v566_v56 = vmax.f32 %v506_v54, 0.0 }
 0x115   : > { %v591_v58 = vpack.c.bf16 %v566_v56, %v565_v55 }
 0x116   : > { %v545_v59 = vpop.f32.mrf.mxu2 }
 0x117   : > { %v546_v60 = vadd.f32 %v1962_v29, %v545_v59  ;;  %1400 = vmatmul.msk.bf16.gmra.mxu1 %vm415_vm0, %v591_v58 }
 0x118   : > { %v508_v61 = vpop.f32.mrf.mxu0 }
 0x119   : > { %v582_v63 = vmax.f32 %v546_v60, 0.0  ;;  %v509_v2 = vadd.f32 %v1962_v29, %v508_v61 }
 0x11b   : > { %v599_v0 = vpack.c.bf16 %v582_v63, %v581_v62  ;;  %v567_v5 = vmax.f32 %v509_v2, 0.0 }
 0x11d   : > { %1408 = vmatmul.msk.bf16.gmra.mxu3 %vm415_vm0, %v599_v0 }
 0x11e   : > { %v548_v1 = vpop.f32.mrf.mxu2 }
 0x11f   : > { %v549_v7 = vadd.f32 %v1962_v29, %v548_v1 }
 0x120   : > { %v510_v3 = vpop.f32.mrf.mxu0 }
 0x121   : > { %v511_v4 = vadd.f32 %v1962_v29, %v510_v3  ;;  %v583_v11 = vmax.f32 %v549_v7, 0.0 }
 0x123   : > { %v568_v6 = vmax.f32 %v511_v4, 0.0 }
 0x125   : > { %v592_v8 = vpack.c.bf16 %v568_v6, %v567_v5 }
 0x126   : > { %v550_v9 = vpop.f32.mrf.mxu2 }
 0x127   : > { %v551_v10 = vadd.f32 %v1962_v29, %v550_v9  ;;  %1401 = vmatmul.msk.bf16.gmra.mxu1 %vm415_vm0, %v592_v8 }
 0x129   : > { %v584_v12 = vmax.f32 %v551_v10, 0.0 }
 0x12b   : > { %v600_v13 = vpack.c.bf16 %v584_v12, %v583_v11 }
 0x12d   : > { %1409 = vmatmul.msk.bf16.gmra.mxu3 %vm415_vm0, %v600_v13 }
 0x134   : > { %v710_v15 = vpop.f32.mrf.mxu1 }
 0x135   : > { %v2018_v16 = vadd.f32 %v2015_v14, %v710_v15 }
 0x137   : > { %790 = vmax.xlane.f32.xlu0 %v2018_v16 }
 0x13c   : > { %v712_v17 = vpop.f32.mrf.mxu1 }
 0x13d   : > { %v2022_v29 = vadd.f32 %v2015_v14, %v712_v17 }
 0x13f   : > { %792 = vmax.xlane.f32.xlu0 %v2022_v29 }
 0x140   : > { %v750_v18 = vpop.f32.mrf.mxu3 }
 0x141   : > { %v2026_v19 = vadd.f32 %v2015_v14, %v750_v18 }
 0x143   : > { %822 = vmax.xlane.f32.xlu1 %v2026_v19 }
 0x144   : > { %v715_v20 = vpop.f32.mrf.mxu1 }
 0x145   : > { %v2030_v22 = vadd.f32 %v2015_v14, %v715_v20 }
 0x148   : > { %v752_v21 = vpop.f32.mrf.mxu3 }
 0x149   : > { %v2033_v23 = vadd.f32 %v2015_v14, %v752_v21 }
 0x14b   : > { %824 = vmax.xlane.f32.xlu2 %v2033_v23  ;;  %794 = vmax.xlane.f32.xlu1 %v2030_v22 }
 0x14c   : > { %v717_v24 = vpop.f32.mrf.mxu1 }
 0x14d   : > { %v2038_v26 = vadd.f32 %v2015_v14, %v717_v24 }
 0x150   : > { %v755_v25 = vpop.f32.mrf.mxu3 }
 0x151   : > { %v2041_v27 = vadd.f32 %v2015_v14, %v755_v25 }
 0x153   : > { %796 = vmax.xlane.f32.xlu1 %v2038_v26  ;;  %826 = vmax.xlane.f32.xlu0 %v2041_v27 }
 0x154   : > { %v720_v28 = vpop.f32.mrf.mxu1 }
 0x155   : > { %v2046_v30 = vadd.f32 %v2015_v14, %v720_v28 }
 0x157   : > { %798 = vmax.xlane.f32.xlu2 %v2046_v30 }
 0x158   : > { %v757_v31 = vpop.f32.mrf.mxu3 }
 0x159   : > { %v2050_v32 = vadd.f32 %v2015_v14, %v757_v31 }
 0x15b   : > { %828 = vmax.xlane.f32.xlu1 %v2050_v32 }
 0x15c   : > { %v722_v33 = vpop.f32.mrf.mxu1 }
 0x15d   : > { %v2054_v34 = vadd.f32 %v2015_v14, %v722_v33 }
 0x15f   : > { %800 = vmax.xlane.f32.xlu2 %v2054_v34 }
 0x160   : > { %v760_v35 = vpop.f32.mrf.mxu3 }
 0x161   : > { %v2058_v37 = vadd.f32 %v2015_v14, %v760_v35 }
 0x164   : > { %v725_v36 = vpop.f32.mrf.mxu1 }
 0x165   : > { %v2061_v38 = vadd.f32 %v2015_v14, %v725_v36 }
 0x167   : > { %830 = vmax.xlane.f32.xlu2 %v2058_v37  ;;  %802 = vmax.xlane.f32.xlu0 %v2061_v38 }
 0x168   : > { %v762_v39 = vpop.f32.mrf.mxu3 }
 0x169   : > { %v2066_v41 = vadd.f32 %v2015_v14, %v762_v39 }
 0x16c   : > { %v727_v40 = vpop.f32.mrf.mxu1 }
 0x16d   : > { %v2069_v42 = vadd.f32 %v2015_v14, %v727_v40 }
 0x16f   : > { %804 = vmax.xlane.f32.xlu1 %v2069_v42  ;;  %832 = vmax.xlane.f32.xlu0 %v2066_v41 }
 0x170   : > { %v765_v43 = vpop.f32.mrf.mxu3 }
 0x171   : > { %v2074_v45 = vadd.f32 %v2015_v14, %v765_v43 }
 0x174   : > { %v730_v44 = vpop.f32.mrf.mxu1 }
 0x175   : > { %v2077_v46 = vadd.f32 %v2015_v14, %v730_v44 }
 0x177   : > { %806 = vmax.xlane.f32.xlu2 %v2077_v46  ;;  %834 = vmax.xlane.f32.xlu1 %v2074_v45 }
 0x178   : > { %v767_v47 = vpop.f32.mrf.mxu3 }
 0x179   : > { %v2082_v49 = vadd.f32 %v2015_v14, %v767_v47 }
 0x17c   : > { %v732_v48 = vpop.f32.mrf.mxu1 }
 0x17d   : > { %v2085_v50 = vadd.f32 %v2015_v14, %v732_v48 }
 0x17f   : > { %836 = vmax.xlane.f32.xlu2 %v2082_v49  ;;  %808 = vmax.xlane.f32.xlu0 %v2085_v50 }
 0x180   : > { %v770_v51 = vpop.f32.mrf.mxu3 }
 0x181   : > { %v2090_v53 = vadd.f32 %v2015_v14, %v770_v51 }
 0x184   : > { %v735_v52 = vpop.f32.mrf.mxu1 }
 0x185   : > { %v2093_v54 = vadd.f32 %v2015_v14, %v735_v52 }
 0x187   : > { %810 = vmax.xlane.f32.xlu1 %v2093_v54  ;;  %838 = vmax.xlane.f32.xlu0 %v2090_v53 }
 0x188   : > { %v772_v55 = vpop.f32.mrf.mxu3 }
 0x189   : > { %v2098_v57 = vadd.f32 %v2015_v14, %v772_v55 }
 0x18c   : > { %v737_v56 = vpop.f32.mrf.mxu1 }
 0x18d   : > { %v2101_v58 = vadd.f32 %v2015_v14, %v737_v56 }
 0x18f   : > { %812 = vmax.xlane.f32.xlu2 %v2101_v58  ;;  %840 = vmax.xlane.f32.xlu1 %v2098_v57 }
 0x190   : > { %v775_v59 = vpop.f32.mrf.mxu3 }
 0x191   : > { %v2106_v61 = vadd.f32 %v2015_v14, %v775_v59 }
 0x194   : > { %v740_v60 = vpop.f32.mrf.mxu1 }
 0x195   : > { %v2109_v62 = vadd.f32 %v2015_v14, %v740_v60 }
 0x197   : > { %842 = vmax.xlane.f32.xlu2 %v2106_v61  ;;  %814 = vmax.xlane.f32.xlu0 %v2109_v62 }
 0x198   : > { %v777_v63 = vpop.f32.mrf.mxu3 }
 0x199   : > { %v2114_v1 = vadd.f32 %v2015_v14, %v777_v63 }
 0x19c   : > { %v742_v0 = vpop.f32.mrf.mxu1 }
 0x19d   : > { %v2117_v2 = vadd.f32 %v2015_v14, %v742_v0 }
 0x19f   : > { %816 = vmax.xlane.f32.xlu1 %v2117_v2  ;;  %844 = vmax.xlane.f32.xlu0 %v2114_v1 }
 0x1a0   : > { %v780_v3 = vpop.f32.mrf.mxu3 }
 0x1a1   : > { %v2122_v5 = vadd.f32 %v2015_v14, %v780_v3 }
 0x1a4   : > { %v745_v4 = vpop.f32.mrf.mxu1 }
 0x1a5   : > { %v2125_v6 = vadd.f32 %v2015_v14, %v745_v4 }
 0x1a7   : > { %818 = vmax.xlane.f32.xlu2 %v2125_v6  ;;  %846 = vmax.xlane.f32.xlu1 %v2122_v5 }
 0x1a8   : > { %v782_v7 = vpop.f32.mrf.mxu3 }
 0x1a9   : > { %v2133_v11 = vadd.f32 %v2015_v14, %v782_v7 }
 0x1aa   : > { %v791_v8 = vpop.xlane.xlu0 %790 }
 0x1ab   : > { %v2130_v9 = vsub.f32 %v2018_v16, %v791_v8 }
 0x1ac   : > { %v747_v10 = vpop.f32.mrf.mxu1 }
 0x1ad   : > { %v886_v12 = vmul.f32 1.442695, %v2130_v9  ;;  %v2137_v13 = vadd.f32 %v2015_v14, %v747_v10 }
 0x1af   : > { %1597 = vpow2.f32 %v886_v12  ;;  %848 = vmax.xlane.f32.xlu2 %v2133_v11  ;;  %820 = vmax.xlane.f32.xlu0 %v2137_v13 }
 0x1b0   : > { %v785_v15 = vpop.f32.mrf.mxu3 }
 0x1b1   : > { %v2145_v20 = vadd.f32 %v2015_v14, %v785_v15 }
 0x1b2   : > { %v793_v17 = vpop.xlane.xlu0 %792 }
 0x1b3   : > { %v2142_v18 = vsub.f32 %v2022_v29, %v793_v17 }
 0x1b5   : > { %v1598_v16 = vpop.eup %1597  ;;  %v888_v21 = vmul.f32 1.442695, %v2142_v18 }
 0x1b6   : > { %v823_v24 = vpop.xlane.xlu1 %822 }
 0x1b7   : > { %1599 = vpow2.f32 %v888_v21  ;;  %850 = vmax.xlane.f32.xlu0 %v2145_v20  ;;  %950 = vadd.xlane.f32.xlu2 %v1598_v16  ;;  %v2150_v25 = vsub.f32 %v2026_v19, %v823_v24 }
 0x1b8   : > { %v787_v28 = vpop.f32.mrf.mxu3 }
 0x1b9   : > { %v2153_v31 = vadd.f32 %v2015_v14, %v787_v28  ;;  %v918_v29 = vmul.f32 1.442695, %v2150_v25 }
 0x1bb   : > { %852 = vmax.xlane.f32.xlu1 %v2153_v31  ;;  %1601 = vpow2.f32 %v918_v29 }
 0x1bd   : > { %v1600_v33 = vpop.eup %1599 }
 0x1be   : > { %v795_v35 = vpop.xlane.xlu1 %794  ;;  %v825_v39 = vpop.xlane.xlu2 %824 }
 0x1bf   : > { %v2158_v36 = vsub.f32 %v2030_v22, %v795_v35  ;;  %952 = vadd.xlane.f32.xlu0 %v1600_v33  ;;  %v2163_v40 = vsub.f32 %v2033_v23, %v825_v39 }
 0x1c1   : > { %v890_v19 = vmul.f32 1.442695, %v2158_v36  ;;  %v1602_v14 = vpop.eup %1601  ;;  %v920_v47 = vmul.f32 1.442695, %v2163_v40 }
 0x1c3   : > { %1603 = vpow2.f32 %v890_v19 }
 0x1c6   : > { %v797_v43 = vpop.xlane.xlu1 %796  ;;  %v827_v22 = vpop.xlane.xlu0 %826 }
 0x1c7   : > { %v2166_v44 = vsub.f32 %v2038_v26, %v797_v43  ;;  %982 = vadd.xlane.f32.xlu0 %v1602_v14  ;;  %v2171_v55 = vsub.f32 %v2041_v27, %v827_v22 }
 0x1c9   : > { %v892_v48 = vmul.f32 1.442695, %v2166_v44  ;;  %v1604_v51 = vpop.eup %1603  ;;  %v922_v59 = vmul.f32 1.442695, %v2171_v55 }
 0x1ca   : > { %v799_v52 = vpop.xlane.xlu2 %798  ;;  %954 = vadd.xlane.f32.xlu1 %v1604_v51 }
 0x1cb   : > { %1605 = vpow2.f32 %v892_v48  ;;  %v2174_v23 = vsub.f32 %v2046_v30, %v799_v52 }
 0x1cc   : > { %1607 = vpow2.f32 %v920_v47 }
 0x1cd   : > { %v894_v26 = vmul.f32 1.442695, %v2174_v23 }
 0x1ce   : > { %v829_v56 = vpop.xlane.xlu1 %828 }
 0x1cf   : > { %1609 = vpow2.f32 %v894_v26  ;;  %v2179_v60 = vsub.f32 %v2050_v32, %v829_v56 }
 0x1d0   : > { %1611 = vpow2.f32 %v922_v59 }
 0x1d1   : > { %v1606_v63 = vpop.eup %1605  ;;  %v924_v3 = vmul.f32 1.442695, %v2179_v60 }
 0x1d2   : > { %v1608_v0 = vpop.eup %1607  ;;  %v801_v27 = vpop.xlane.xlu2 %800  ;;  %956 = vadd.xlane.f32.xlu2 %v1606_v63 }
 0x1d3   : > { %v2183_v30 = vsub.f32 %v2054_v34, %v801_v27  ;;  %984 = vadd.xlane.f32.xlu1 %v1608_v0  ;;  %1613 = vpow2.f32 %v924_v3 }
 0x1d5   : > { %v1610_v4 = vpop.eup %1609  ;;  %v896_v7 = vmul.f32 1.442695, %v2183_v30 }
 0x1d6   : > { %958 = vadd.xlane.f32.xlu0 %v1610_v4  ;;  %v1612_v8 = vpop.eup %1611 }
 0x1d7   : > { %1615 = vpow2.f32 %v896_v7 }
 0x1d9   : > { %v1614_v17 = vpop.eup %1613 }
 0x1da   : > { %v831_v32 = vpop.xlane.xlu2 %830  ;;  %986 = vadd.xlane.f32.xlu2 %v1612_v8  ;;  %v803_v10 = vpop.xlane.xlu0 %802 }
 0x1db   : > { %v2187_v12 = vsub.f32 %v2058_v37, %v831_v32  ;;  %v2190_v15 = vsub.f32 %v2061_v38, %v803_v10 }
 0x1dd   : > { %v1616_v34 = vpop.eup %1615  ;;  %v926_v16 = vmul.f32 1.442695, %v2187_v12  ;;  %v898_v21 = vmul.f32 1.442695, %v2190_v15 }
 0x1de   : > { %960 = vadd.xlane.f32.xlu1 %v1616_v34  ;;  %988 = vadd.xlane.f32.xlu0 %v1614_v17 }
 0x1df   : > { %1617 = vpow2.f32 %v926_v16 }
 0x1e0   : > { %1619 = vpow2.f32 %v898_v21 }
 0x1e2   : > { %v805_v24 = vpop.xlane.xlu1 %804  ;;  %v833_v28 = vpop.xlane.xlu0 %832 }
 0x1e3   : > { %v2195_v29 = vsub.f32 %v2069_v42, %v805_v24  ;;  %v2198_v37 = vsub.f32 %v2066_v41, %v833_v28 }
 0x1e5   : > { %v1618_v38 = vpop.eup %1617  ;;  %v900_v33 = vmul.f32 1.442695, %v2195_v29  ;;  %v928_v35 = vmul.f32 1.442695, %v2198_v37 }
 0x1e6   : > { %v1620_v39 = vpop.eup %1619  ;;  %990 = vadd.xlane.f32.xlu1 %v1618_v38 }
 0x1e7   : > { %1621 = vpow2.f32 %v900_v33  ;;  %962 = vadd.xlane.f32.xlu2 %v1620_v39 }
 0x1e8   : > { %1623 = vpow2.f32 %v928_v35 }
 0x1ea   : > { %v807_v19 = vpop.xlane.xlu2 %806  ;;  %v835_v14 = vpop.xlane.xlu1 %834 }
 0x1eb   : > { %v2203_v43 = vsub.f32 %v2077_v46, %v807_v19  ;;  %v2206_v42 = vsub.f32 %v2074_v45, %v835_v14 }
 0x1ed   : > { %v1622_v41 = vpop.eup %1621  ;;  %v902_v47 = vmul.f32 1.442695, %v2203_v43  ;;  %v930_v22 = vmul.f32 1.442695, %v2206_v42 }
 0x1ee   : > { %v1624_v48 = vpop.eup %1623  ;;  %964 = vadd.xlane.f32.xlu0 %v1622_v41 }
 0x1ef   : > { %1625 = vpow2.f32 %v902_v47  ;;  %992 = vadd.xlane.f32.xlu2 %v1624_v48 }
 0x1f0   : > { %1627 = vpow2.f32 %v930_v22 }
 0x1f2   : > { %v837_v51 = vpop.xlane.xlu2 %836  ;;  %v809_v52 = vpop.xlane.xlu0 %808 }
 0x1f3   : > { %v2211_v26 = vsub.f32 %v2082_v49, %v837_v51  ;;  %v2214_v46 = vsub.f32 %v2085_v50, %v809_v52 }
 0x1f5   : > { %v1626_v45 = vpop.eup %1625  ;;  %v932_v56 = vmul.f32 1.442695, %v2211_v26  ;;  %v904_v59 = vmul.f32 1.442695, %v2214_v46 }
 0x1f6   : > { %v1628_v63 = vpop.eup %1627  ;;  %966 = vadd.xlane.f32.xlu1 %v1626_v45 }
 0x1f7   : > { %1629 = vpow2.f32 %v932_v56  ;;  %994 = vadd.xlane.f32.xlu0 %v1628_v63 }
 0x1f8   : > { %1631 = vpow2.f32 %v904_v59 }
 0x1fa   : > { %v811_v0 = vpop.xlane.xlu1 %810  ;;  %v839_v3 = vpop.xlane.xlu0 %838 }
 0x1fb   : > { %v2219_v27 = vsub.f32 %v2093_v54, %v811_v0  ;;  %v2222_v49 = vsub.f32 %v2090_v53, %v839_v3 }
 0x1fd   : > { %v1630_v50 = vpop.eup %1629  ;;  %v906_v4 = vmul.f32 1.442695, %v2219_v27  ;;  %v934_v7 = vmul.f32 1.442695, %v2222_v49 }
 0x1fe   : > { %v1632_v8 = vpop.eup %1631  ;;  %996 = vadd.xlane.f32.xlu1 %v1630_v50 }
 0x1ff   : > { %1633 = vpow2.f32 %v906_v4  ;;  %968 = vadd.xlane.f32.xlu2 %v1632_v8 }
 0x200   : > { %1635 = vpow2.f32 %v934_v7 }
 0x202   : > { %v813_v32 = vpop.xlane.xlu2 %812  ;;  %v841_v10 = vpop.xlane.xlu1 %840 }
 0x203   : > { %v2227_v17 = vsub.f32 %v2101_v58, %v813_v32  ;;  %v2230_v54 = vsub.f32 %v2098_v57, %v841_v10 }
 0x205   : > { %v1634_v53 = vpop.eup %1633  ;;  %v908_v34 = vmul.f32 1.442695, %v2227_v17  ;;  %v936_v16 = vmul.f32 1.442695, %v2230_v54 }
 0x206   : > { %v1636_v21 = vpop.eup %1635  ;;  %970 = vadd.xlane.f32.xlu0 %v1634_v53 }
 0x207   : > { %1637 = vpow2.f32 %v908_v34  ;;  %998 = vadd.xlane.f32.xlu2 %v1636_v21 }
 0x208   : > { %1639 = vpow2.f32 %v936_v16 }
 0x20a   : > { %v843_v24 = vpop.xlane.xlu2 %842  ;;  %v815_v28 = vpop.xlane.xlu0 %814 }
 0x20b   : > { %v2235_v38 = vsub.f32 %v2106_v61, %v843_v24  ;;  %v2238_v58 = vsub.f32 %v2109_v62, %v815_v28 }
 0x20d   : > { %v1638_v57 = vpop.eup %1637  ;;  %v938_v33 = vmul.f32 1.442695, %v2235_v38  ;;  %v910_v35 = vmul.f32 1.442695, %v2238_v58 }
 0x20e   : > { %v1640_v39 = vpop.eup %1639  ;;  %972 = vadd.xlane.f32.xlu1 %v1638_v57 }
 0x20f   : > { %1641 = vpow2.f32 %v938_v33  ;;  %1000 = vadd.xlane.f32.xlu0 %v1640_v39 }
 0x210   : > { %1643 = vpow2.f32 %v910_v35 }
 0x212   : > { %v817_v19 = vpop.xlane.xlu1 %816  ;;  %v845_v14 = vpop.xlane.xlu0 %844 }
 0x213   : > { %v2243_v41 = vsub.f32 %v2117_v2, %v817_v19  ;;  %v2246_v61 = vsub.f32 %v2114_v1, %v845_v14 }
 0x215   : > { %v1642_v62 = vpop.eup %1641  ;;  %v912_v47 = vmul.f32 1.442695, %v2243_v41  ;;  %v940_v22 = vmul.f32 1.442695, %v2246_v61 }
 0x216   : > { %v1644_v48 = vpop.eup %1643  ;;  %1002 = vadd.xlane.f32.xlu1 %v1642_v62 }
 0x217   : > { %1645 = vpow2.f32 %v912_v47  ;;  %974 = vadd.xlane.f32.xlu2 %v1644_v48 }
 0x218   : > { %1647 = vpow2.f32 %v940_v22 }
 0x21a   : > { %v819_v51 = vpop.xlane.xlu2 %818  ;;  %v847_v52 = vpop.xlane.xlu1 %846 }
 0x21b   : > { %v2251_v45 = vsub.f32 %v2125_v6, %v819_v51  ;;  %v2254_v2 = vsub.f32 %v2122_v5, %v847_v52 }
 0x21d   : > { %v1646_v1 = vpop.eup %1645  ;;  %v914_v56 = vmul.f32 1.442695, %v2251_v45  ;;  %v942_v59 = vmul.f32 1.442695, %v2254_v2 }
 0x21e   : > { %v1648_v63 = vpop.eup %1647  ;;  %976 = vadd.xlane.f32.xlu0 %v1646_v1 }
 0x21f   : > { %1649 = vpow2.f32 %v914_v56  ;;  %1004 = vadd.xlane.f32.xlu2 %v1648_v63 }
 0x220   : > { %1651 = vpow2.f32 %v942_v59 }
 0x222   : > { %v849_v0 = vpop.xlane.xlu2 %848  ;;  %v821_v3 = vpop.xlane.xlu0 %820 }
 0x223   : > { %v2259_v50 = vsub.f32 %v2133_v11, %v849_v0  ;;  %v2262_v6 = vsub.f32 %v2137_v13, %v821_v3 }
 0x225   : > { %v1650_v5 = vpop.eup %1649  ;;  %v944_v4 = vmul.f32 1.442695, %v2259_v50  ;;  %v916_v7 = vmul.f32 1.442695, %v2262_v6 }
 0x226   : > { %v1652_v8 = vpop.eup %1651  ;;  %978 = vadd.xlane.f32.xlu1 %v1650_v5 }
 0x227   : > { %1653 = vpow2.f32 %v944_v4  ;;  %1006 = vadd.xlane.f32.xlu0 %v1652_v8 }
 0x228   : > { %1655 = vpow2.f32 %v916_v7 }
 0x22a   : > { %v851_v32 = vpop.xlane.xlu0 %850  ;;  %v951_v11 = vpop.xlane.xlu2 %950 }
 0x22b   : > { %v2267_v10 = vsub.f32 %v2145_v20, %v851_v32 }
 0x22d   : > { %v1654_v53 = vpop.eup %1653  ;;  %v946_v34 = vmul.f32 1.442695, %v2267_v10 }
 0x22e   : > { %v1656_v13 = vpop.eup %1655  ;;  %1008 = vadd.xlane.f32.xlu1 %v1654_v53  ;;  %v853_v16 = vpop.xlane.xlu1 %852 }
 0x22f   : > { %1657 = vpow2.f32 %v946_v34  ;;  %v2271_v21 = vsub.f32 %v2153_v31, %v853_v16  ;;  %980 = vadd.xlane.f32.xlu2 %v1656_v13 }
 0x230   : > { %1659 = vlog2.f32 %v951_v11 }
 0x231   : > { %v948_v24 = vmul.f32 1.442695, %v2271_v21 }
 0x232   : > { %v953_v28 = vpop.xlane.xlu0 %952 }
 0x233   : > { %1661 = vpow2.f32 %v948_v24 }
 0x234   : > { %1663 = vlog2.f32 %v953_v28 }
 0x235   : > { %v1658_v20 = vpop.eup %1657 }
 0x236   : > { %v1660_v57 = vpop.eup %1659 }
 0x237   : > { %1010 = vadd.xlane.f32.xlu2 %v1658_v20  ;;  %v1015_v35 = vmul.f32 0.6931472, %v1660_v57 }
 0x239   : > { %v1662_v33 = vpop.eup %1661  ;;  %v1078_v31 = vsub.f32 %v2130_v9, %v1015_v35 }
 0x23a   : > { %v1664_v39 = vpop.eup %1663  ;;  %1012 = vadd.xlane.f32.xlu0 %v1662_v33  ;;  %v983_v22 = vpop.xlane.xlu0 %982 }
 0x23b   : > { %v1017_v19 = vmul.f32 0.6931472, %v1664_v39 }
 0x23d   : > { %v1079_v14 = vsub.f32 %v2142_v18, %v1017_v19  ;;  %v955_v62 = vpop.xlane.xlu1 %954 }
 0x23e   : > { %1665 = vlog2.f32 %v955_v62 }
 0x23f   : > { %v1451_v47 = vpack.c.bf16 %v1079_v14, %v1078_v31  ;;  %1667 = vlog2.f32 %v983_v22 }
 0x241   : > { %1452 = vst [vmem:[%s2278_s11] sm:$0xff] %v1451_v47  }
 0x244   : > { %v1666_v52 = vpop.eup %1665 }
 0x245   : > { %v957_v48 = vpop.xlane.xlu2 %956  ;;  %v1668_v1 = vpop.eup %1667  ;;  %v1019_v59 = vmul.f32 0.6931472, %v1666_v52 }
 0x246   : > { %v985_v51 = vpop.xlane.xlu1 %984  ;;  %1669 = vlog2.f32 %v957_v48  ;;  %v1047_v63 = vmul.f32 0.6931472, %v1668_v1 }
 0x247   : > { %1671 = vlog2.f32 %v985_v51  ;;  %v1080_v4 = vsub.f32 %v2158_v36, %v1019_v59 }
 0x248   : > { %v1094_v8 = vsub.f32 %v2150_v25, %v1047_v63 }
 0x249   : > { %v959_v56 = vpop.xlane.xlu0 %958 }
 0x24a   : > { %1673 = vlog2.f32 %v959_v56 }
 0x24c   : > { %v1670_v9 = vpop.eup %1669 }
 0x24d   : > { %v1672_v18 = vpop.eup %1671  ;;  %v1021_v0 = vmul.f32 0.6931472, %v1670_v9  ;;  %v987_v3 = vpop.xlane.xlu2 %986 }
 0x24e   : > { %v1049_v5 = vmul.f32 0.6931472, %v1672_v18  ;;  %1675 = vlog2.f32 %v987_v3 }
 0x24f   : > { %v1081_v7 = vsub.f32 %v2166_v44, %v1021_v0 }
 0x250   : > { %v1095_v32 = vsub.f32 %v2163_v40, %v1049_v5  ;;  %v1674_v16 = vpop.eup %1673 }
 0x251   : > { %v1456_v53 = vpack.c.bf16 %v1081_v7, %v1080_v4  ;;  %v961_v11 = vpop.xlane.xlu1 %960  ;;  %v989_v34 = vpop.xlane.xlu0 %988  ;;  %v1023_v28 = vmul.f32 0.6931472, %v1674_v16 }
 0x252   : > { %v1491_v13 = vpack.c.bf16 %v1095_v32, %v1094_v8  ;;  %1677 = vlog2.f32 %v961_v11 }
 0x253   : > { %1528 = vst [vmem:[%s2278_s11 + $0x8] sm:$0xff] %v1456_v53   ;;  %1679 = vlog2.f32 %v989_v34  ;;  %v1082_v40 = vsub.f32 %v2174_v23, %v1023_v28 }
 0x254   : > { %1535 = vst [vmem:[%s2278_s11 + $0x40] sm:$0xff] %v1491_v13   ;;  %v1676_v24 = vpop.eup %1675 }
 0x255   : > { %v1051_v44 = vmul.f32 0.6931472, %v1676_v24 }
 0x257   : > { %v1096_v39 = vsub.f32 %v2171_v55, %v1051_v44 }
 0x258   : > { %v1678_v36 = vpop.eup %1677 }
 0x259   : > { %v1680_v20 = vpop.eup %1679  ;;  %v1025_v57 = vmul.f32 0.6931472, %v1678_v36  ;;  %v991_v31 = vpop.xlane.xlu1 %990 }
 0x25a   : > { %v1053_v25 = vmul.f32 0.6931472, %v1680_v20  ;;  %v963_v33 = vpop.xlane.xlu2 %962 }
 0x25b   : > { %v1083_v35 = vsub.f32 %v2183_v30, %v1025_v57  ;;  %1681 = vlog2.f32 %v963_v33 }
 0x25c   : > { %v1097_v19 = vsub.f32 %v2179_v60, %v1053_v25  ;;  %1683 = vlog2.f32 %v991_v31 }
 0x25d   : > { %v1461_v14 = vpack.c.bf16 %v1083_v35, %v1082_v40 }
 0x25e   : > { %v1496_v62 = vpack.c.bf16 %v1097_v19, %v1096_v39 }
 0x25f   : > { %1529 = vst [vmem:[%s2278_s11 + $0x10] sm:$0xff] %v1461_v14  }
 0x260   : > { %1536 = vst [vmem:[%s2278_s11 + $0x48] sm:$0xff] %v1496_v62  }
 0x261   : > { %v965_v47 = vpop.xlane.xlu0 %964  ;;  %v1682_v48 = vpop.eup %1681 }
 0x262   : > { %v993_v22 = vpop.xlane.xlu2 %992  ;;  %1685 = vlog2.f32 %v965_v47  ;;  %v1684_v51 = vpop.eup %1683  ;;  %v1027_v23 = vmul.f32 0.6931472, %v1682_v48 }
 0x263   : > { %1687 = vlog2.f32 %v993_v22  ;;  %v1055_v55 = vmul.f32 0.6931472, %v1684_v51 }
 0x264   : > { %v1084_v59 = vsub.f32 %v2190_v15, %v1027_v23 }
 0x265   : > { %v1098_v18 = vsub.f32 %v2187_v12, %v1055_v55 }
 0x268   : > { %v1686_v30 = vpop.eup %1685 }
 0x269   : > { %v1688_v52 = vpop.eup %1687  ;;  %v1029_v60 = vmul.f32 0.6931472, %v1686_v30  ;;  %v967_v1 = vpop.xlane.xlu1 %966 }
 0x26a   : > { %v1057_v56 = vmul.f32 0.6931472, %v1688_v52  ;;  %v995_v63 = vpop.xlane.xlu0 %994 }
 0x26b   : > { %v1085_v9 = vsub.f32 %v2195_v29, %v1029_v60  ;;  %1689 = vlog2.f32 %v995_v63 }
 0x26c   : > { %v1099_v0 = vsub.f32 %v2198_v37, %v1057_v56  ;;  %1691 = vlog2.f32 %v967_v1 }
 0x26d   : > { %v1466_v3 = vpack.c.bf16 %v1085_v9, %v1084_v59 }
 0x26e   : > { %v1501_v5 = vpack.c.bf16 %v1099_v0, %v1098_v18 }
 0x26f   : > { %1530 = vst [vmem:[%s2278_s11 + $0x18] sm:$0xff] %v1466_v3  }
 0x270   : > { %1537 = vst [vmem:[%s2278_s11 + $0x50] sm:$0xff] %v1501_v5  }
 0x271   : > { %v997_v4 = vpop.xlane.xlu1 %996  ;;  %v1690_v8 = vpop.eup %1689 }
 0x272   : > { %1693 = vlog2.f32 %v997_v4  ;;  %v969_v7 = vpop.xlane.xlu2 %968  ;;  %v1692_v32 = vpop.eup %1691  ;;  %v1059_v15 = vmul.f32 0.6931472, %v1690_v8 }
 0x273   : > { %1695 = vlog2.f32 %v969_v7  ;;  %v1031_v53 = vmul.f32 0.6931472, %v1692_v32 }
 0x274   : > { %v1100_v13 = vsub.f32 %v2206_v42, %v1059_v15 }
 0x275   : > { %v1086_v24 = vsub.f32 %v2203_v43, %v1031_v53 }
 0x278   : > { %v1694_v29 = vpop.eup %1693 }
 0x279   : > { %v1696_v12 = vpop.eup %1695  ;;  %v1061_v11 = vmul.f32 0.6931472, %v1694_v29  ;;  %v971_v37 = vpop.xlane.xlu0 %970 }
 0x27a   : > { %v1033_v34 = vmul.f32 0.6931472, %v1696_v12  ;;  %v999_v36 = vpop.xlane.xlu2 %998  ;;  %1697 = vlog2.f32 %v971_v37 }
 0x27b   : > { %v1101_v16 = vsub.f32 %v2211_v26, %v1061_v11  ;;  %1699 = vlog2.f32 %v999_v36 }
 0x27c   : > { %v1087_v28 = vsub.f32 %v2214_v46, %v1033_v34 }
 0x27d   : > { %v1506_v44 = vpack.c.bf16 %v1101_v16, %v1100_v13 }
 0x27e   : > { %v1471_v20 = vpack.c.bf16 %v1087_v28, %v1086_v24 }
 0x27f   : > { %1538 = vst [vmem:[%s2278_s11 + $0x58] sm:$0xff] %v1506_v44  }
 0x280   : > { %1531 = vst [vmem:[%s2278_s11 + $0x20] sm:$0xff] %v1471_v20   ;;  %v1698_v33 = vpop.eup %1697 }
 0x281   : > { %v973_v57 = vpop.xlane.xlu1 %972  ;;  %v1700_v40 = vpop.eup %1699  ;;  %v1035_v42 = vmul.f32 0.6931472, %v1698_v33 }
 0x282   : > { %1701 = vlog2.f32 %v973_v57  ;;  %v1001_v25 = vpop.xlane.xlu0 %1000  ;;  %v1063_v43 = vmul.f32 0.6931472, %v1700_v40 }
 0x283   : > { %1703 = vlog2.f32 %v1001_v25  ;;  %v1088_v31 = vsub.f32 %v2219_v27, %v1035_v42 }
 0x284   : > { %v1102_v62 = vsub.f32 %v2222_v49, %v1063_v43 }
 0x288   : > { %v1702_v26 = vpop.eup %1701 }
 0x289   : > { %v1704_v35 = vpop.eup %1703  ;;  %v1037_v46 = vmul.f32 0.6931472, %v1702_v26  ;;  %v1003_v22 = vpop.xlane.xlu1 %1002 }
 0x28a   : > { %v1065_v39 = vmul.f32 0.6931472, %v1704_v35  ;;  %v975_v19 = vpop.xlane.xlu2 %974 }
 0x28b   : > { %v1089_v14 = vsub.f32 %v2227_v17, %v1037_v46  ;;  %1705 = vlog2.f32 %v975_v19 }
 0x28c   : > { %v1103_v47 = vsub.f32 %v2230_v54, %v1065_v39  ;;  %1707 = vlog2.f32 %v1003_v22 }
 0x28d   : > { %v1476_v48 = vpack.c.bf16 %v1089_v14, %v1088_v31 }
 0x28e   : > { %v1511_v51 = vpack.c.bf16 %v1103_v47, %v1102_v62 }
 0x28f   : > { %1532 = vst [vmem:[%s2278_s11 + $0x28] sm:$0xff] %v1476_v48  }
 0x290   : > { %1539 = vst [vmem:[%s2278_s11 + $0x60] sm:$0xff] %v1511_v51  }
 0x291   : > { %v977_v23 = vpop.xlane.xlu0 %976  ;;  %v1706_v55 = vpop.eup %1705 }
 0x292   : > { %v1005_v30 = vpop.xlane.xlu2 %1004  ;;  %1709 = vlog2.f32 %v977_v23  ;;  %v1708_v52 = vpop.eup %1707  ;;  %v1039_v27 = vmul.f32 0.6931472, %v1706_v55 }
 0x293   : > { %1711 = vlog2.f32 %v1005_v30  ;;  %v1067_v49 = vmul.f32 0.6931472, %v1708_v52 }
 0x294   : > { %v1090_v59 = vsub.f32 %v2238_v58, %v1039_v27 }
 0x295   : > { %v1104_v18 = vsub.f32 %v2235_v38, %v1067_v49 }
 0x298   : > { %v1710_v17 = vpop.eup %1709 }
 0x299   : > { %v1712_v60 = vpop.eup %1711  ;;  %v1041_v54 = vmul.f32 0.6931472, %v1710_v17  ;;  %v979_v1 = vpop.xlane.xlu1 %978 }
 0x29a   : > { %v1069_v56 = vmul.f32 0.6931472, %v1712_v60  ;;  %v1007_v63 = vpop.xlane.xlu0 %1006 }
 0x29b   : > { %v1091_v9 = vsub.f32 %v2243_v41, %v1041_v54  ;;  %1713 = vlog2.f32 %v1007_v63 }
 0x29c   : > { %v1105_v0 = vsub.f32 %v2246_v61, %v1069_v56  ;;  %1715 = vlog2.f32 %v979_v1 }
 0x29d   : > { %v1481_v3 = vpack.c.bf16 %v1091_v9, %v1090_v59 }
 0x29e   : > { %v1516_v5 = vpack.c.bf16 %v1105_v0, %v1104_v18 }
 0x29f   : > { %1533 = vst [vmem:[%s2278_s11 + $0x30] sm:$0xff] %v1481_v3  }
 0x2a0   : > { %1540 = vst [vmem:[%s2278_s11 + $0x68] sm:$0xff] %v1516_v5  }
 0x2a1   : > { %v1009_v4 = vpop.xlane.xlu1 %1008  ;;  %v1714_v8 = vpop.eup %1713 }
 0x2a2   : > { %1717 = vlog2.f32 %v1009_v4  ;;  %v981_v7 = vpop.xlane.xlu2 %980  ;;  %v1716_v32 = vpop.eup %1715  ;;  %v1071_v58 = vmul.f32 0.6931472, %v1714_v8 }
 0x2a3   : > { %1719 = vlog2.f32 %v981_v7  ;;  %v1043_v15 = vmul.f32 0.6931472, %v1716_v32 }
 0x2a4   : > { %v1106_v12 = vsub.f32 %v2254_v2, %v1071_v58 }
 0x2a5   : > { %v1092_v37 = vsub.f32 %v2251_v45, %v1043_v15 }
 0x2a8   : > { %v1718_v41 = vpop.eup %1717 }
 0x2a9   : > { %v1720_v38 = vpop.eup %1719  ;;  %v1073_v29 = vmul.f32 0.6931472, %v1718_v41 }
 0x2aa   : > { %v1045_v61 = vmul.f32 0.6931472, %v1720_v38  ;;  %v1011_v53 = vpop.xlane.xlu2 %1010 }
 0x2ab   : > { %v1107_v11 = vsub.f32 %v2259_v50, %v1073_v29  ;;  %1721 = vlog2.f32 %v1011_v53 }
 0x2ac   : > { %v1093_v34 = vsub.f32 %v2262_v6, %v1045_v61 }
 0x2ad   : > { %v1521_v13 = vpack.c.bf16 %v1107_v11, %v1106_v12  ;;  %v1013_v16 = vpop.xlane.xlu0 %1012 }
 0x2ae   : > { %v1486_v24 = vpack.c.bf16 %v1093_v34, %v1092_v37  ;;  %1723 = vlog2.f32 %v1013_v16 }
 0x2af   : > { %1541 = vst [vmem:[%s2278_s11 + $0x70] sm:$0xff] %v1521_v13  }
 0x2b0   : > { %1534 = vst [vmem:[%s2278_s11 + $0x38] sm:$0xff] %v1486_v24  }
 0x2b1   : > { %v1722_v28 = vpop.eup %1721 }
 0x2b2   : > { %v1075_v36 = vmul.f32 0.6931472, %v1722_v28 }
 0x2b4   : > { %v1724_v44 = vpop.eup %1723  ;;  %v1108_v2 = vsub.f32 %v2267_v10, %v1075_v36 }
 0x2b5   : > { %v1077_v20 = vmul.f32 0.6931472, %v1724_v44 }
 0x2b7   : > { %v1109_v50 = vsub.f32 %v2271_v21, %v1077_v20  ;;  %1181 = sbr.rel (!%p1871_p5) target bundleno = 731 (0x2db), region = 44 }
 0x2b9   : > { %v1526_v57 = vpack.c.bf16 %v1109_v50, %v1108_v2 }
 0x2bb   : > { %1542 = vst [vmem:[%s2278_s11 + $0x78] sm:$0xff] %v1526_v57  }
 0x2bc   : > { %s2403_s13 = smov (!%p1184_p11, %s1183_s13), 32 }
 0x2bd   : > { %s1412_s14 = sshll.u32 %s2403_s13, 2 }
 0x2be   : > { %s1187_s15 = ssub.s32 128, %s1412_s14 }
 0x2bf   : > { %s1188_s16 = sshll.u32 %s1187_s15, 4 }
 0x2c0   : > { %1189 = vsyncadd %s2328_s12, %s1188_s16  ;;  %p2337_p12 = scmp.ne.s32.totalorder %s1412_s14, 0  ;;  %s1447_s28 = sshll.u32 %s1854_s22, 7 }
 0x2c1   : > { %s1192_s25 = scalar_lea.hbm %s2394_s5, %s1447_s28  ;;  %s1194_s26 = sshll.u32 %s2278_s11, 4  ;;  %s2346_s26 = int_to_ptr.vmem [resolvable:$true] %s1194_s26 }
 0x2c2   : > { %s1196_s30 = sshll.u32 %s1192_s25, 4  ;;  %s1416_s6 = sshll.u32 %s2403_s13, 6  ;;  %s2348_s30 = int_to_ptr.hbm [resolvable:$true] %s1196_s30 }
 0x2c3   : > { %s1725_s7 = sshra.s32 %s2346_s26, 4  ;;  %s1727_s8 = sshrl.u32 %s1416_s6, 4  ;;  %s1726_s7 = int_to_ptr.vmem [resolvable:$true] %s1725_s7 }
 0x2c4   : > { %s1732_s10 = scalar_lea.vmem %s1726_s7, %s1727_s8  ;;  %s1800_s22 = smov [#allocation2]  }
 0x2c5   : > { %p1733_p13 = scmp.ne.s32.totalorder %s1726_s7, %s1732_s10  ;;  %s1736_s14 = scalar_lea.vmem %s1800_s22, 256 }
 0x2c6   : > { %p1738_p2 = scmp.lt.s32.totalorder %s1736_s14, %s1732_s10 }
 0x2c7   : > { %p1734_p0 = pnand %p1733_p13, %p2337_p12 }
 0x2c9   : > { %p1735_p1 = pneg %p1734_p0 }
 0x2cb   : > { %p1740_p3 = pnand %p1738_p2, %p1735_p1 }
 0x2cd   : > { %1743 = shalt.err (!%p1740_p3)
}
 0x2ce   : > { %s1744_s11 = sshra.s32 %s2348_s30, 4  ;;  %s1755_s23 = scalar_lea.hbm %s2394_s5, 500  ;;  %s1745_s11 = int_to_ptr.hbm [resolvable:$true] %s1744_s11 }
 0x2cf   : > { %s1751_s15 = scalar_lea.hbm %s1745_s11, %s1727_s8  ;;  %p1756_p8 = scmp.lt.s32.totalorder %s1745_s11, %s2394_s5 }
 0x2d0   : > { %p1752_p4 = scmp.ne.s32.totalorder %s1745_s11, %s1751_s15  ;;  %p1757_p9 = scmp.lt.s32.totalorder %s1755_s23, %s1751_s15 }
 0x2d2   : > { %p1753_p5 = pnand %p1752_p4, %p2337_p12  ;;  %p1758_p10 = por %p1757_p9, %p1756_p8 }
 0x2d4   : > { %p1754_p7 = pneg %p1753_p5 }
 0x2d6   : > { %p1759_p11 = pnand %p1758_p10, %p1754_p7 }
 0x2d8   : > { %1762 = shalt.err (!%p1759_p11)
}
 0x2d9   : > { %s1801_s7 = smov 64   ;;  %s1802_s8 = smov 4  }
 0x2da   : > { %1202 = dma.vmem_to_hbm [thread:$0]  (%p2337_p12), %s2346_s26, %s1416_s6, %s2348_s30, %s2328_s12, %s1801_s7, %s1801_s7, %s1802_s8  }
 0x2db PF: > { %p1560_p13 = scmp.ge.s32.totalorder %s1798_s21, 2  ;;  %s1211_s10 = sand.u32 1, %s1786_s18  }
 0x2dc   : > { %s1212_s22 = scalar_lea.sflag [#allocation3], %s1211_s10 }
 0x2dd   : > { %p1557_p0 = pnand %p1560_p13, %p1875_p6 }
 0x2df   : > { %p1558_p1 = pneg %p1557_p0 }
 0x2e1   : > { %1781 = dma.done.wait (%p1558_p1), %s1212_s22, 2048  }
 0x2e2   : > { %1783 = vsyncadd (%p1558_p1), %s1212_s22, 4294965248  ;;  %p15_p2 = scmp.ge.s32.totalorder %s1858_s24, 6   ;;  %s2398_s18 = smov %s1790_s19 }
 0x2e3   : > { %s2399_s19 = smov %s1794_s20  ;;  %s2400_s20 = smov %s1869_s27 }
 0x2e4   : > { %s2401_s21 = smov %s1858_s24  ;;  %17 = sbr.rel (!%p15_p2) target bundleno = 3 (0x3), region = 75 }
 0x2e9   :  { %1218 = vsyncpa [#allocation3], 1 }
 0x2ea   :  { %1220 = vsyncpa [#allocation3 + $0x1], 1 }

</bundles_post_ra>
